<compile_context>
chip_gen: v6e
topology: v6e:2x2x1
jax: 0.10.0
libtpu: 0.0.40
codegen_flags: <defaults>
</compile_context>

<pallas_src>
from functools import partial

import jax
import jax.numpy as jnp
from jax.experimental import pallas as pl
from jax.experimental.pallas import tpu as pltpu

_SQRT1_2 = 0.7071067811865476
_MIB = 1024 * 1024


def _tpu_vmem_capacity_bytes():
    """Physical per-core VMEM (128 MiB on v5e/v6e, 64 MiB on v7x)."""
    try:
        return int(pltpu.get_tpu_info().vmem_capacity_bytes)
    except Exception:
        return 64 * _MIB  # conservative fallback (v7x per-core VMEM)


_VMEM_PHYS = _tpu_vmem_capacity_bytes()
# Scoped limit requested from Mosaic (leave headroom for compiler scratch).
_VMEM_LIMIT = max(_VMEM_PHYS - 16 * _MIB, 32 * _MIB)
# Admission budgets used to pick an execution strategy (the footprint
# estimates below already count every input double-buffered).
_FUSED_VMEM_BUDGET = max(_VMEM_PHYS - 24 * _MIB, 28 * _MIB)
_TILED_VMEM_BUDGET = max(_VMEM_PHYS - 32 * _MIB, 24 * _MIB)


def _round_up(x, m):
    return ((x + m - 1) // m) * m


def _sublane(dtype):
    """Dtype-aware sublane multiple: fp32 -> 8 rows, bf16 -> 16, int8/fp8 -> 32."""
    return max(8, 32 // jnp.dtype(dtype).itemsize)


def _divisor_tile(dim_p, want):
    """Largest multiple of 128 that divides dim_p (a 128-multiple) and is <= want."""
    best, t = 128, 128
    cap = min(want, dim_p)
    while t <= cap:
        if dim_p % t == 0:
            best = t
        t += 128
    return best


def _apply_activation(y, activation):
    """Elementwise activations matching MLP.activation_map (trace-time dispatch)."""
    if activation == "identity":
        return y
    if activation == "gelu":  # PyTorch nn.GELU() default = exact erf form
        return 0.5 * y * (1.0 + jax.lax.erf(y * _SQRT1_2))
    if activation == "relu":
        return jnp.maximum(y, 0.0)
    if activation == "leaky_relu":  # negative_slope=0.2 per the module
        return jnp.where(y >= 0.0, y, 0.2 * y)
    if activation == "elu":
        return jnp.where(y >= 0.0, y, jnp.expm1(y))
    if activation == "tanh":
        return jnp.tanh(y)
    if activation == "sigmoid":
        return jax.nn.sigmoid(y)
    raise NotImplementedError(activation)


# ----------------------------------------------------------------------------
# Per-layer tiled Linear (+ bias, + activation) kernels  (fallback path)
# ----------------------------------------------------------------------------
def _linear_acc_kernel(x_ref, w_ref, b_ref, o_ref, acc_ref, *, activation):
    # K-reduction is the last grid axis; fp32 accumulator lives in VMEM scratch.
    @pl.when(pl.program_id(2) == 0)
    def _init():
        acc_ref[...] = jnp.zeros_like(acc_ref)

    acc_ref[...] += jnp.dot(x_ref[...], w_ref[...],
                            preferred_element_type=jnp.float32)

    @pl.when(pl.program_id(2) == pl.num_programs(2) - 1)
    def _finalize():
        y = _apply_activation(acc_ref[...] + b_ref[...], activation)
        o_ref[...] = y.astype(o_ref.dtype)


def _linear_single_k_kernel(x_ref, w_ref, b_ref, o_ref, *, activation):
    # Single K step: no accumulator round-trip, no predicated init/finalize.
    y = jnp.dot(x_ref[...], w_ref[...], preferred_element_type=jnp.float32)
    o_ref[...] = _apply_activation(y + b_ref[...], activation).astype(o_ref.dtype)


def pallas_linear(x, w, b, activation="identity", *, compute_dtype=None,
                  out_dtype=None, tm=256, tn=512, tk=512):
    """y = activation(x @ w + b); x:(M,K), w:(K,N), b:(N,) or (1,N).

    Tiles are chosen as divisors of the 128-padded dims, so weights that were
    pre-padded once (prepare_params) are never re-padded per call.
    """
    M, K = x.shape
    K2, N = w.shape
    assert K == K2, (x.shape, w.shape)
    b2 = b.reshape(1, -1).astype(jnp.float32)
    assert b2.shape[1] == N

    compute_dtype = jnp.dtype(compute_dtype or x.dtype)
    out_dtype = jnp.dtype(out_dtype or x.dtype)
    in_item = compute_dtype.itemsize
    out_item = out_dtype.itemsize
    sub_m = _sublane(compute_dtype)

    Kp = _round_up(K, 128)
    Np = _round_up(N, 128)
    tk = _divisor_tile(Kp, tk)
    tn = _divisor_tile(Np, tn)
    tm = min(_round_up(tm, sub_m), _round_up(M, sub_m))

    # Shrink tiles until the double-buffered footprint fits the VMEM budget.
    def _footprint(tm_, tn_, tk_):
        fp = 2 * in_item * (tm_ * tk_ + tk_ * tn_)   # x / w tiles (double-buffered)
        fp += 2 * 4 * tn_                            # bias tile
        fp += 2 * out_item * tm_ * tn_               # output tile
        fp += 4 * tm_ * tn_                          # fp32 accumulator scratch
        return fp

    while _footprint(tm, tn, tk) > _TILED_VMEM_BUDGET:
        if tk > 128:
            tk = _divisor_tile(Kp, tk - 128)
        elif tn > 128:
            tn = _divisor_tile(Np, tn - 128)
        elif tm > sub_m:
            tm = max(sub_m, tm // 2)
        else:
            break

    Mp = _round_up(M, tm)

    xp = x.astype(compute_dtype)
    if (Mp, Kp) != (M, K):
        xp = jnp.pad(xp, ((0, Mp - M), (0, Kp - K)))
    wp = w.astype(compute_dtype)
    if (Kp, Np) != (K, N):
        wp = jnp.pad(wp, ((0, Kp - K), (0, Np - N)))
    bp = b2
    if Np != N:
        bp = jnp.pad(bp, ((0, 0), (0, Np - N)))

    nk = Kp // tk
    if nk == 1:
        grid = (Mp // tm, Np // tn)
        in_specs = [
            pl.BlockSpec((tm, tk), lambda i, j: (i, 0)),   # x tile
            pl.BlockSpec((tk, tn), lambda i, j: (0, j)),   # w tile
            pl.BlockSpec((1, tn), lambda i, j: (0, j)),    # bias tile
        ]
        out_specs = pl.BlockSpec((tm, tn), lambda i, j: (i, j))
        scratch = []
        kernel = partial(_linear_single_k_kernel, activation=activation)
        dims = ("parallel", "parallel")
    else:
        grid = (Mp // tm, Np // tn, nk)
        in_specs = [
            pl.BlockSpec((tm, tk), lambda i, j, k: (i, k)),   # x tile
            # If still HBM-bound after bf16 streaming, deepen the weight
            # prefetch with pipeline_mode=pl.Buffered(3) on this spec.
            pl.BlockSpec((tk, tn), lambda i, j, k: (k, j)),   # w tile
            pl.BlockSpec((1, tn), lambda i, j, k: (0, j)),    # bias tile
        ]
        out_specs = pl.BlockSpec((tm, tn), lambda i, j, k: (i, j))
        scratch = [pltpu.VMEM((tm, tn), jnp.float32)]
        kernel = partial(_linear_acc_kernel, activation=activation)
        dims = ("parallel", "parallel", "arbitrary")

    out = pl.pallas_call(
        kernel,
        out_shape=jax.ShapeDtypeStruct((Mp, Np), out_dtype),
        grid_spec=pltpu.PrefetchScalarGridSpec(
            num_scalar_prefetch=0, grid=grid, in_specs=in_specs,
            out_specs=out_specs, scratch_shapes=scratch),
        compiler_params=pltpu.CompilerParams(
            dimension_semantics=dims, vmem_limit_bytes=_VMEM_LIMIT),
    )(xp, wp, bp)

    if (Mp, Np) != (M, N):
        out = out[:M, :N]
    return out


# ----------------------------------------------------------------------------
# VMEM footprint estimates (conservative: every input counted double-buffered)
# ----------------------------------------------------------------------------
def _resident_vmem_bytes(bm, Kp, Lp, Np, n_layer, compute_dtype, out_dtype):
    ci = jnp.dtype(compute_dtype).itemsize
    oi = jnp.dtype(out_dtype).itemsize
    return (2 * ci * (bm * Kp + Kp * Lp + n_layer * Lp * Lp + Lp * Np)
            + 2 * 4 * ((n_layer + 1) * Lp + Np)
            + 2 * oi * bm * Np
            + 4 * bm * Lp)                                    # fp32 h scratch


def _streamed_vmem_bytes(Mp, Kp, Lp, Np, compute_dtype, out_dtype):
    ci = jnp.dtype(compute_dtype).itemsize
    oi = jnp.dtype(out_dtype).itemsize
    return (2 * ci * (Mp * Kp + Kp * Lp + Lp * Np)            # resident x/W_in/W_out
            + 2 * 4 * (2 * Lp + Np)                           # biases
            + 2 * (ci * Lp * Lp + 4 * Lp)                     # streamed hidden W/b
            + 2 * oi * Mp * Np
            + 4 * Mp * Lp)                                    # fp32 h scratch


# ----------------------------------------------------------------------------
# Fully-resident MLP kernel: all weights in VMEM, one grid step per batch block
# ----------------------------------------------------------------------------
def _resident_mlp_kernel(x_ref, w_in_ref, b_in_ref, w_h_ref, b_h_ref,
                         w_out_ref, b_out_ref, o_ref, h_ref, *,
                         n_layer, activation, final_activation, compute_dtype):
    # Input layer.
    h = jnp.dot(x_ref[...], w_in_ref[...], preferred_element_type=jnp.float32)
    h_ref[...] = _apply_activation(h + b_in_ref[...], activation)

    # Hidden layers: everything is VMEM-resident, so a fully unrolled static
    # loop (static ref indices) gives the scheduler the whole chain to overlap.
    for l in range(n_layer):
        h = jnp.dot(h_ref[...].astype(compute_dtype), w_h_ref[l],
                    preferred_element_type=jnp.float32)
        h_ref[...] = _apply_activation(h + b_h_ref[l], activation)

    # Output layer (lane-dense padded slab, sliced by the wrapper).
    y = jnp.dot(h_ref[...].astype(compute_dtype), w_out_ref[...],
                preferred_element_type=jnp.float32)
    o_ref[...] = _apply_activation(y + b_out_ref[...],
                                   final_activation).astype(o_ref.dtype)


def pallas_mlp_resident(x, prep, activation="gelu",
                        final_activation="identity", out_dtype=None):
    out_dtype = jnp.dtype(out_dtype or x.dtype)
    cd = prep.compute_dtype
    M, K = x.shape
    assert K == prep.in_dim and prep.w_h is not None
    sub_m = _sublane(cd)
    Kp, Lp, Np, n_layer = prep.Kp, prep.Lp, prep.Np, prep.n_layer

    # Batch block: whole batch for small M, otherwise 256-row blocks; the
    # batch-block axis is "parallel" so a 2-TC v7x shards larger batches.
    bm = min(_round_up(M, sub_m), 256)
    while (_resident_vmem_bytes(bm, Kp, Lp, Np, n_layer, cd, out_dtype)
           > _FUSED_VMEM_BUDGET) and bm > sub_m:
        bm = max(sub_m, bm // 2)
    Mp = _round_up(M, bm)

    xp = x.astype(cd)
    if (Mp, Kp) != (M, K):
        xp = jnp.pad(xp, ((0, Mp - M), (0, Kp - K)))

    kernel = partial(_resident_mlp_kernel, n_layer=n_layer,
                     activation=activation, final_activation=final_activation,
                     compute_dtype=cd)

    out = pl.pallas_call(
        kernel,
        out_shape=jax.ShapeDtypeStruct((Mp, Np), out_dtype),
        grid_spec=pltpu.PrefetchScalarGridSpec(
            num_scalar_prefetch=0,
            grid=(Mp // bm,),
            in_specs=[
                pl.BlockSpec((bm, Kp), lambda i: (i, 0)),              # x (batch block)
                pl.BlockSpec((Kp, Lp), lambda i: (0, 0)),              # W_in
                pl.BlockSpec((1, Lp), lambda i: (0, 0)),               # b_in
                pl.BlockSpec((n_layer, Lp, Lp), lambda i: (0, 0, 0)),  # hidden W (all)
                pl.BlockSpec((n_layer, 1, Lp), lambda i: (0, 0, 0)),   # hidden b (all)
                pl.BlockSpec((Lp, Np), lambda i: (0, 0)),              # W_out
                pl.BlockSpec((1, Np), lambda i: (0, 0)),               # b_out
            ],
            out_specs=pl.BlockSpec((bm, Np), lambda i: (i, 0)),
            scratch_shapes=[pltpu.VMEM((bm, Lp), jnp.float32)],
        ),
        compiler_params=pltpu.CompilerParams(
            dimension_semantics=("parallel",),
            vmem_limit_bytes=_VMEM_LIMIT),
    )(xp, prep.w_in, prep.b_in, prep.w_h, prep.b_h, prep.w_out, prep.b_out)

    if (Mp, Np) != (M, prep.out_dim):
        out = out[:M, :prep.out_dim]
    return out


# ----------------------------------------------------------------------------
# Streamed-hidden-weights fused MLP kernel (large latent): grid over layers
# ----------------------------------------------------------------------------
def _streamed_mlp_kernel(x_ref, w_in_ref, b_in_ref, w_h_ref, b_h_ref,
                         w_out_ref, b_out_ref, o_ref, h_ref, *,
                         activation, final_activation, compute_dtype):
    layer = pl.program_id(0)

    @pl.when(layer == 0)
    def _first_layer():
        h = jnp.dot(x_ref[...], w_in_ref[...],
                    preferred_element_type=jnp.float32)
        h_ref[...] = _apply_activation(h + b_in_ref[...], activation)

    # Hidden layer `layer`: its (latent, latent) weight streams per grid step
    # while the activation stays resident in fp32 VMEM scratch (no HBM trip).
    h = jnp.dot(h_ref[...].astype(compute_dtype), w_h_ref[...],
                preferred_element_type=jnp.float32)
    h_ref[...] = _apply_activation(h + b_h_ref[...], activation)

    @pl.when(layer == pl.num_programs(0) - 1)
    def _final_layer():
        y = jnp.dot(h_ref[...].astype(compute_dtype), w_out_ref[...],
                    preferred_element_type=jnp.float32)
        y = _apply_activation(y + b_out_ref[...], final_activation)
        o_ref[...] = y.astype(o_ref.dtype)


def pallas_mlp_streamed(x, prep, activation="gelu",
                        final_activation="identity", out_dtype=None):
    out_dtype = jnp.dtype(out_dtype or x.dtype)
    cd = prep.compute_dtype
    M, K = x.shape
    assert K == prep.in_dim and prep.n_layer >= 1 and prep.w_h is not None
    Kp, Lp, Np, n_layer = prep.Kp, prep.Lp, prep.Np, prep.n_layer
    Mp = _round_up(M, _sublane(cd))

    xp = x.astype(cd)
    if (Mp, Kp) != (M, K):
        xp = jnp.pad(xp, ((0, Mp - M), (0, Kp - K)))

    kernel = partial(_streamed_mlp_kernel, activation=activation,
                     final_activation=final_activation, compute_dtype=cd)

    out = pl.pallas_call(
        kernel,
        out_shape=jax.ShapeDtypeStruct((Mp, Np), out_dtype),
        grid_spec=pltpu.PrefetchScalarGridSpec(
            num_scalar_prefetch=0,
            grid=(n_layer,),
            in_specs=[
                pl.BlockSpec((Mp, Kp), lambda l: (0, 0)),                   # x (resident)
                pl.BlockSpec((Kp, Lp), lambda l: (0, 0)),                   # W_in (resident)
                pl.BlockSpec((1, Lp), lambda l: (0, 0)),                    # b_in
                pl.BlockSpec((pl.Squeezed(), Lp, Lp), lambda l: (l, 0, 0)),  # hidden W (streamed)
                pl.BlockSpec((pl.Squeezed(), 1, Lp), lambda l: (l, 0, 0)),   # hidden b (streamed)
                pl.BlockSpec((Lp, Np), lambda l: (0, 0)),                   # W_out (resident)
                pl.BlockSpec((1, Np), lambda l: (0, 0)),                    # b_out
            ],
            out_specs=pl.BlockSpec((Mp, Np), lambda l: (0, 0)),
            scratch_shapes=[pltpu.VMEM((Mp, Lp), jnp.float32)],
        ),
        compiler_params=pltpu.CompilerParams(
            # The layer axis carries state (h scratch) -> must be "arbitrary".
            dimension_semantics=("arbitrary",),
            vmem_limit_bytes=_VMEM_LIMIT),
    )(xp, prep.w_in, prep.b_in, prep.w_h, prep.b_h, prep.w_out, prep.b_out)

    if (Mp, Np) != (M, prep.out_dim):
        out = out[:M, :prep.out_dim]
    return out


# ----------------------------------------------------------------------------
# One-time parameter preparation + forward dispatch
# ----------------------------------------------------------------------------
class PreparedMLP:
    """MLP weights preprocessed once (cast / padded / stacked) for the kernels."""

    def __init__(self, **kw):
        self.__dict__.update(kw)


def prepare_params(params, *, compute_dtype=None, max_batch=1024):
    """One-time weight preprocessing, hoisted out of the per-forward path.

    Casts to the streaming dtype (bf16 by default when latent >= 2048 --
    accumulation stays fp32 inside the kernels; note the input x is also
    streamed in this dtype), pads every dim to lane(128)/sublane multiples and
    stacks the hidden (latent,latent) layers, so forward passes stream
    ready-to-use weights with no extra HBM cast/pad/stack traffic.
    """
    assert len(params) >= 2
    (w_in, b_in) = params[0]
    hidden = list(params[1:-1])
    (w_out, b_out) = params[-1]
    n_layer = len(hidden)

    in_dim, latent = w_in.shape
    out_dim = w_out.shape[1]
    assert w_out.shape[0] == latent
    for w, _ in hidden:
        assert w.shape == (latent, latent)

    if compute_dtype is None:
        compute_dtype = jnp.bfloat16 if latent >= 2048 else w_in.dtype
    compute_dtype = jnp.dtype(compute_dtype)

    Kp = _round_up(in_dim, 128)
    Lp = _round_up(latent, 128)
    Np = _round_up(out_dim, 128)
    sub_m = _sublane(compute_dtype)

    def _pad_w(a, shape):
        a = a.astype(compute_dtype)
        if a.shape == shape:
            return a
        return jnp.pad(a, [(0, s - d) for d, s in zip(a.shape, shape)])

    def _pad_b(bb, n):
        bb = bb.astype(jnp.float32).reshape(1, -1)
        if bb.shape[1] == n:
            return bb
        return jnp.pad(bb, ((0, 0), (0, n - bb.shape[1])))

    # Generation-aware strategy selection (the forward re-checks with the
    # actual batch size and can only downgrade).
    if n_layer >= 1 and _resident_vmem_bytes(
            sub_m, Kp, Lp, Np, n_layer, compute_dtype,
            jnp.float32) <= _FUSED_VMEM_BUDGET:
        strategy = "resident"
    elif n_layer >= 1 and _streamed_vmem_bytes(
            _round_up(max(max_batch, 1), sub_m), Kp, Lp, Np, compute_dtype,
            jnp.float32) <= _FUSED_VMEM_BUDGET:
        strategy = "streamed"
    else:
        strategy = "perlayer"

    prep = PreparedMLP(strategy=strategy, compute_dtype=compute_dtype,
                       in_dim=in_dim, latent=latent, out_dim=out_dim,
                       n_layer=n_layer, Kp=Kp, Lp=Lp, Np=Np,
                       w_in=None, b_in=None, w_h=None, b_h=None,
                       w_out=None, b_out=None, layers=None)

    if strategy in ("resident", "streamed"):
        prep.w_in = _pad_w(w_in, (Kp, Lp))
        prep.b_in = _pad_b(b_in, Lp)
        prep.w_h = jnp.stack([_pad_w(w, (Lp, Lp)) for w, _ in hidden])
        prep.b_h = jnp.stack([_pad_b(bb, Lp) for _, bb in hidden])
        prep.w_out = _pad_w(w_out, (Lp, Np))
        prep.b_out = _pad_b(b_out, Np)
    else:
        # Per-layer tiled path (huge latent / VMEM-poor chip): store each layer
        # already padded to 128-multiples so the tiled kernel never re-pads.
        layers = [(_pad_w(w_in, (Kp, Lp)), _pad_b(b_in, Lp))]
        layers += [(_pad_w(w, (Lp, Lp)), _pad_b(bb, Lp)) for w, bb in hidden]
        layers += [(_pad_w(w_out, (Lp, Np)), _pad_b(b_out, Np))]
        prep.layers = layers
    return prep


def init_mlp_params(key, in_dim, out_dim, n_layer=2, latent_dim=4096,
                    dtype=jnp.float32):
    """Deterministic init mimicking nn.Linear's uniform(-1/sqrt(fan_in), ...)."""
    dims = [in_dim] + [latent_dim] * (n_layer + 1) + [out_dim]
    params = []
    for d_in, d_out in zip(dims[:-1], dims[1:]):
        key, kw, kb = jax.random.split(key, 3)
        bound = 1.0 / jnp.sqrt(d_in)
        # Store weight already transposed to (in, out) for y = x @ W.
        w = jax.random.uniform(kw, (d_in, d_out), dtype, -bound, bound)
        b = jax.random.uniform(kb, (d_out,), dtype, -bound, bound)
        params.append((w, b))
    return params


def mlp_forward(x, params=None, activation="gelu", final_activation="identity",
                *, prepared=None, compute_dtype=None, force_strategy=None):
    """MLP forward pass. Pass `prepared=prepare_params(params)` to hoist all
    weight cast/pad/stack HBM traffic out of the per-call path (recommended)."""
    if prepared is None:
        assert params is not None
        prepared = prepare_params(params, compute_dtype=compute_dtype,
                                  max_batch=x.shape[0])
    prep = prepared
    out_dtype = x.dtype
    cd = prep.compute_dtype
    sub_m = _sublane(cd)
    M = x.shape[0]

    strategy = force_strategy or prep.strategy
    if force_strategy is None:
        # Re-check the VMEM admission guard with the actual batch size.
        if strategy == "resident" and _resident_vmem_bytes(
                sub_m, prep.Kp, prep.Lp, prep.Np, prep.n_layer, cd,
                out_dtype) > _FUSED_VMEM_BUDGET:
            strategy = "streamed"
        if strategy == "streamed" and (
                prep.n_layer < 1 or prep.w_h is None or _streamed_vmem_bytes(
                    _round_up(M, sub_m), prep.Kp, prep.Lp, prep.Np, cd,
                    out_dtype) > _FUSED_VMEM_BUDGET):
            strategy = "perlayer"

    if strategy == "resident":
        return pallas_mlp_resident(x, prep, activation, final_activation,
                                   out_dtype)
    if strategy == "streamed":
        return pallas_mlp_streamed(x, prep, activation, final_activation,
                                   out_dtype)

    # Per-layer tiled fallback.
    layers = prep.layers
    if layers is None:
        # Rare downgrade from a fused-format bundle: slice the stacked hidden
        # weights (one extra copy per layer per call).
        layers = ([(prep.w_in, prep.b_in)]
                  + [(prep.w_h[l], prep.b_h[l]) for l in range(prep.n_layer)]
                  + [(prep.w_out, prep.b_out)])
    y = x.astype(cd)
    if prep.Kp != prep.in_dim:
        y = jnp.pad(y, ((0, 0), (0, prep.Kp - prep.in_dim)))
    n_lin = len(layers)
    for li, (w, b) in enumerate(layers):
        act = activation if li < n_lin - 1 else final_activation
        y = pallas_linear(y, w, b, activation=act, compute_dtype=cd,
                          out_dtype=(out_dtype if li == n_lin - 1 else cd))
    return y[:, :prep.out_dim]


# Pure-JAX reference (fp32, HIGHEST matmul precision) for correctness checks.
def mlp_forward_ref(x, params, activation="gelu", final_activation="identity"):
    n = len(params)
    for li, (w, b) in enumerate(params):
        x = jnp.dot(x, w, precision=jax.lax.Precision.HIGHEST) + b
        x = _apply_activation(x, activation if li < n - 1 else final_activation)
    return x


if __name__ == "__main__":
    key = jax.random.PRNGKey(0)
    kx, kp = jax.random.split(key)

    # Small shapes consistent with the module (batch of feature vectors).
    batch, in_dim, latent_dim, out_dim, n_layer = 16, 32, 256, 16, 2

    x = jax.random.normal(kx, (batch, in_dim), dtype=jnp.float32)
    params = init_mlp_params(kp, in_dim, out_dim, n_layer=n_layer,
                             latent_dim=latent_dim)
    y_ref = mlp_forward_ref(x, params)

    # One-time weight preprocessing (hoisted out of the forward path).
    prep = prepare_params(params)       # latent < 2048 -> keeps fp32 streaming
    assert prep.strategy == "resident"

    # 1) Fully-resident single-launch path (the deployment regime).
    y_res = jax.block_until_ready(mlp_forward(x, prepared=prep))
    assert y_res.shape == (batch, out_dim)
    assert jnp.allclose(y_res, y_ref, atol=1e-4, rtol=1e-4)

    # 2) Streamed-hidden-weight fused path (large-latent regime), forced here.
    y_str = jax.block_until_ready(
        mlp_forward(x, prepared=prep, force_strategy="streamed"))
    assert jnp.allclose(y_str, y_ref, atol=1e-4, rtol=1e-4)

    # 3) Per-layer tiled fallback path, forced here.
    y_til = jax.block_until_ready(
        mlp_forward(x, prepared=prep, force_strategy="perlayer"))
    assert jnp.allclose(y_til, y_ref, atol=1e-4, rtol=1e-4)

    # 4) bf16 streaming with fp32 accumulation (looser tolerance by design).
    prep_bf16 = prepare_params(params, compute_dtype=jnp.bfloat16)
    y_bf16 = jax.block_until_ready(mlp_forward(x, prepared=prep_bf16))
    rel_err = jnp.max(jnp.abs(y_bf16 - y_ref)) / (jnp.max(jnp.abs(y_ref)) + 1e-6)
    assert rel_err < 0.1, rel_err

    # 5) Exercise the multi-K-step fp32-accumulator tiled kernel explicitly.
    ka, kb = jax.random.split(kp)
    a = jax.random.normal(ka, (64, 512), jnp.float32)
    wt = 0.05 * jax.random.normal(kb, (512, 256), jnp.float32)
    bt = jnp.zeros((256,), jnp.float32)
    y_mm = jax.block_until_ready(
        pallas_linear(a, wt, bt, activation="gelu", tk=128))
    t = jnp.dot(a, wt, precision=jax.lax.Precision.HIGHEST) + bt
    y_mm_ref = 0.5 * t * (1.0 + jax.lax.erf(t * _SQRT1_2))
    assert jnp.allclose(y_mm, y_mm_ref, atol=1e-3, rtol=1e-3)

    print("KERNEL_OK")
</pallas_src>

<mosaic_0001>
module attributes {stable_mosaic.version = 11 : i64} {
  func.func @_resident_mlp_kernel(%arg0: i32, %arg1: memref<16x128xf32, #tpu.memory_space<vmem>>, %arg2: memref<128x256xf32, #tpu.memory_space<vmem>>, %arg3: memref<1x256xf32, #tpu.memory_space<vmem>>, %arg4: memref<2x256x256xf32, #tpu.memory_space<vmem>>, %arg5: memref<2x1x256xf32, #tpu.memory_space<vmem>>, %arg6: memref<256x128xf32, #tpu.memory_space<vmem>>, %arg7: memref<1x128xf32, #tpu.memory_space<vmem>>, %arg8: memref<16x128xf32, #tpu.memory_space<vmem>>, %arg9: memref<16x256xf32, #tpu.memory_space<vmem>>) attributes {dimension_semantics = [#tpu.dimension_semantics<parallel>], iteration_bounds = array<i64: 1>, scalar_prefetch = 0 : i64, scratch_operands = 1 : i64, tpu.core_type = #tpu.core_type<tc>, window_params = [{transform_indices = @transform_0, window_bounds = array<i64: 16, 128>}, {pipeline_mode = #tpu.pipeline_mode<synchronous>, transform_indices = @transform_1, window_bounds = array<i64: 128, 256>}, {pipeline_mode = #tpu.pipeline_mode<synchronous>, transform_indices = @transform_2, window_bounds = array<i64: 1, 256>}, {pipeline_mode = #tpu.pipeline_mode<synchronous>, transform_indices = @transform_3, window_bounds = array<i64: 2, 256, 256>}, {pipeline_mode = #tpu.pipeline_mode<synchronous>, transform_indices = @transform_4, window_bounds = array<i64: 2, 1, 256>}, {pipeline_mode = #tpu.pipeline_mode<synchronous>, transform_indices = @transform_5, window_bounds = array<i64: 256, 128>}, {pipeline_mode = #tpu.pipeline_mode<synchronous>, transform_indices = @transform_6, window_bounds = array<i64: 1, 128>}, {transform_indices = @transform_7, window_bounds = array<i64: 16, 128>}]} {
    %c0 = arith.constant 0 : index
    %c0_0 = arith.constant 0 : index
    %0 = vector.load %arg1[%c0, %c0_0] : memref<16x128xf32, #tpu.memory_space<vmem>>, vector<16x128xf32>
    %c0_1 = arith.constant 0 : index
    %c0_2 = arith.constant 0 : index
    %1 = vector.load %arg2[%c0_1, %c0_2] : memref<128x256xf32, #tpu.memory_space<vmem>>, vector<128x256xf32>
    %cst = arith.constant dense<0.000000e+00> : vector<16x256xf32>
    %2 = tpu.matmul %0, %1, %cst {dimension_numbers = #tpu.dot_dimension_numbers<[1], [0], [0], [1], [0, 0, 1, 1], [], []>} : vector<16x128xf32>, vector<128x256xf32>, vector<16x256xf32> -> vector<16x256xf32>
    %c0_3 = arith.constant 0 : index
    %c0_4 = arith.constant 0 : index
    %3 = vector.load %arg3[%c0_3, %c0_4] : memref<1x256xf32, #tpu.memory_space<vmem>>, vector<1x256xf32>
    %4 = vector.broadcast %3 : vector<1x256xf32> to vector<16x256xf32>
    %5 = arith.addf %2, %4 : vector<16x256xf32>
    %cst_5 = arith.constant 5.000000e-01 : f32
    %6 = vector.broadcast %cst_5 : f32 to vector<16x256xf32>
    %7 = arith.mulf %6, %5 : vector<16x256xf32>
    %cst_6 = arith.constant 0.707106769 : f32
    %8 = vector.broadcast %cst_6 : f32 to vector<16x256xf32>
    %9 = arith.mulf %5, %8 : vector<16x256xf32>
    %10 = math.erf %9 : vector<16x256xf32>
    %cst_7 = arith.constant 1.000000e+00 : f32
    %11 = vector.broadcast %cst_7 : f32 to vector<16x256xf32>
    %12 = arith.addf %11, %10 : vector<16x256xf32>
    %13 = arith.mulf %7, %12 : vector<16x256xf32>
    %c0_8 = arith.constant 0 : index
    %c0_9 = arith.constant 0 : index
    %14 = vector.load %arg9[%c0_8, %c0_9] : memref<16x256xf32, #tpu.memory_space<vmem>>, vector<16x256xf32>
    tpu.vector_store %arg9[%c0_8, %c0_9], %13 {strides = array<i32>} : memref<16x256xf32, #tpu.memory_space<vmem>>, vector<16x256xf32>,
    %c0_10 = arith.constant 0 : index
    %c0_11 = arith.constant 0 : index
    %15 = vector.load %arg9[%c0_10, %c0_11] : memref<16x256xf32, #tpu.memory_space<vmem>>, vector<16x256xf32>
    %c0_12 = arith.constant 0 : index
    %c0_13 = arith.constant 0 : index
    %c0_14 = arith.constant 0 : index
    %16 = vector.load %arg4[%c0_12, %c0_13, %c0_14] : memref<2x256x256xf32, #tpu.memory_space<vmem>>, vector<1x256x256xf32>
    %17 = vector.shape_cast %16 : vector<1x256x256xf32> to vector<256x256xf32>
    %cst_15 = arith.constant dense<0.000000e+00> : vector<16x256xf32>
    %18 = tpu.matmul %15, %17, %cst_15 {dimension_numbers = #tpu.dot_dimension_numbers<[1], [0], [0], [1], [0, 0, 1, 1], [], []>} : vector<16x256xf32>, vector<256x256xf32>, vector<16x256xf32> -> vector<16x256xf32>
    %c0_16 = arith.constant 0 : index
    %c0_17 = arith.constant 0 : index
    %c0_18 = arith.constant 0 : index
    %19 = vector.load %arg5[%c0_16, %c0_17, %c0_18] : memref<2x1x256xf32, #tpu.memory_space<vmem>>, vector<1x1x256xf32>
    %20 = vector.shape_cast %19 : vector<1x1x256xf32> to vector<1x256xf32>
    %21 = vector.broadcast %20 : vector<1x256xf32> to vector<16x256xf32>
    %22 = arith.addf %18, %21 : vector<16x256xf32>
    %cst_19 = arith.constant 5.000000e-01 : f32
    %23 = vector.broadcast %cst_19 : f32 to vector<16x256xf32>
    %24 = arith.mulf %23, %22 : vector<16x256xf32>
    %cst_20 = arith.constant 0.707106769 : f32
    %25 = vector.broadcast %cst_20 : f32 to vector<16x256xf32>
    %26 = arith.mulf %22, %25 : vector<16x256xf32>
    %27 = math.erf %26 : vector<16x256xf32>
    %cst_21 = arith.constant 1.000000e+00 : f32
    %28 = vector.broadcast %cst_21 : f32 to vector<16x256xf32>
    %29 = arith.addf %28, %27 : vector<16x256xf32>
    %30 = arith.mulf %24, %29 : vector<16x256xf32>
    %c0_22 = arith.constant 0 : index
    %c0_23 = arith.constant 0 : index
    %31 = vector.load %arg9[%c0_22, %c0_23] : memref<16x256xf32, #tpu.memory_space<vmem>>, vector<16x256xf32>
    tpu.vector_store %arg9[%c0_22, %c0_23], %30 {strides = array<i32>} : memref<16x256xf32, #tpu.memory_space<vmem>>, vector<16x256xf32>,
    %c0_24 = arith.constant 0 : index
    %c0_25 = arith.constant 0 : index
    %32 = vector.load %arg9[%c0_24, %c0_25] : memref<16x256xf32, #tpu.memory_space<vmem>>, vector<16x256xf32>
    %c1 = arith.constant 1 : index
    %c0_26 = arith.constant 0 : index
    %c0_27 = arith.constant 0 : index
    %33 = vector.load %arg4[%c1, %c0_26, %c0_27] : memref<2x256x256xf32, #tpu.memory_space<vmem>>, vector<1x256x256xf32>
    %34 = vector.shape_cast %33 : vector<1x256x256xf32> to vector<256x256xf32>
    %cst_28 = arith.constant dense<0.000000e+00> : vector<16x256xf32>
    %35 = tpu.matmul %32, %34, %cst_28 {dimension_numbers = #tpu.dot_dimension_numbers<[1], [0], [0], [1], [0, 0, 1, 1], [], []>} : vector<16x256xf32>, vector<256x256xf32>, vector<16x256xf32> -> vector<16x256xf32>
    %c1_29 = arith.constant 1 : index
    %c0_30 = arith.constant 0 : index
    %c0_31 = arith.constant 0 : index
    %36 = vector.load %arg5[%c1_29, %c0_30, %c0_31] : memref<2x1x256xf32, #tpu.memory_space<vmem>>, vector<1x1x256xf32>
    %37 = vector.shape_cast %36 : vector<1x1x256xf32> to vector<1x256xf32>
    %38 = vector.broadcast %37 : vector<1x256xf32> to vector<16x256xf32>
    %39 = arith.addf %35, %38 : vector<16x256xf32>
    %cst_32 = arith.constant 5.000000e-01 : f32
    %40 = vector.broadcast %cst_32 : f32 to vector<16x256xf32>
    %41 = arith.mulf %40, %39 : vector<16x256xf32>
    %cst_33 = arith.constant 0.707106769 : f32
    %42 = vector.broadcast %cst_33 : f32 to vector<16x256xf32>
    %43 = arith.mulf %39, %42 : vector<16x256xf32>
    %44 = math.erf %43 : vector<16x256xf32>
    %cst_34 = arith.constant 1.000000e+00 : f32
    %45 = vector.broadcast %cst_34 : f32 to vector<16x256xf32>
    %46 = arith.addf %45, %44 : vector<16x256xf32>
    %47 = arith.mulf %41, %46 : vector<16x256xf32>
    %c0_35 = arith.constant 0 : index
    %c0_36 = arith.constant 0 : index
    %48 = vector.load %arg9[%c0_35, %c0_36] : memref<16x256xf32, #tpu.memory_space<vmem>>, vector<16x256xf32>
    tpu.vector_store %arg9[%c0_35, %c0_36], %47 {strides = array<i32>} : memref<16x256xf32, #tpu.memory_space<vmem>>, vector<16x256xf32>,
    %c0_37 = arith.constant 0 : index
    %c0_38 = arith.constant 0 : index
    %49 = vector.load %arg9[%c0_37, %c0_38] : memref<16x256xf32, #tpu.memory_space<vmem>>, vector<16x256xf32>
    %c0_39 = arith.constant 0 : index
    %c0_40 = arith.constant 0 : index
    %50 = vector.load %arg6[%c0_39, %c0_40] : memref<256x128xf32, #tpu.memory_space<vmem>>, vector<256x128xf32>
    %cst_41 = arith.constant dense<0.000000e+00> : vector<16x128xf32>
    %51 = tpu.matmul %49, %50, %cst_41 {dimension_numbers = #tpu.dot_dimension_numbers<[1], [0], [0], [1], [0, 0, 1, 1], [], []>} : vector<16x256xf32>, vector<256x128xf32>, vector<16x128xf32> -> vector<16x128xf32>
    %c0_42 = arith.constant 0 : index
    %c0_43 = arith.constant 0 : index
    %52 = vector.load %arg7[%c0_42, %c0_43] : memref<1x128xf32, #tpu.memory_space<vmem>>, vector<1x128xf32>
    %53 = vector.broadcast %52 : vector<1x128xf32> to vector<16x128xf32>
    %54 = arith.addf %51, %53 : vector<16x128xf32>
    %c0_44 = arith.constant 0 : index
    %c0_45 = arith.constant 0 : index
    %55 = vector.load %arg8[%c0_44, %c0_45] : memref<16x128xf32, #tpu.memory_space<vmem>>, vector<16x128xf32>
    tpu.vector_store %arg8[%c0_44, %c0_45], %54 {strides = array<i32>} : memref<16x128xf32, #tpu.memory_space<vmem>>, vector<16x128xf32>,
    return
  }
  func.func @transform_0(%arg0: i32) -> (i32, i32) {
    %c0_i32 = arith.constant 0 : i32
    %c0_i32_0 = arith.constant 0 : i32
    return %arg0, %c0_i32 : i32, i32
  }
  func.func @transform_1(%arg0: i32) -> (i32, i32) {
    %c0_i32 = arith.constant 0 : i32
    %c0_i32_0 = arith.constant 0 : i32
    %c0_i32_1 = arith.constant 0 : i32
    return %c0_i32, %c0_i32_0 : i32, i32
  }
  func.func @transform_2(%arg0: i32) -> (i32, i32) {
    %c0_i32 = arith.constant 0 : i32
    %c0_i32_0 = arith.constant 0 : i32
    %c0_i32_1 = arith.constant 0 : i32
    return %c0_i32, %c0_i32_0 : i32, i32
  }
  func.func @transform_3(%arg0: i32) -> (i32, i32, i32) {
    %c0_i32 = arith.constant 0 : i32
    %c0_i32_0 = arith.constant 0 : i32
    %c0_i32_1 = arith.constant 0 : i32
    %c0_i32_2 = arith.constant 0 : i32
    return %c0_i32, %c0_i32_0, %c0_i32_1 : i32, i32, i32
  }
  func.func @transform_4(%arg0: i32) -> (i32, i32, i32) {
    %c0_i32 = arith.constant 0 : i32
    %c0_i32_0 = arith.constant 0 : i32
    %c0_i32_1 = arith.constant 0 : i32
    %c0_i32_2 = arith.constant 0 : i32
    return %c0_i32, %c0_i32_0, %c0_i32_1 : i32, i32, i32
  }
  func.func @transform_5(%arg0: i32) -> (i32, i32) {
    %c0_i32 = arith.constant 0 : i32
    %c0_i32_0 = arith.constant 0 : i32
    %c0_i32_1 = arith.constant 0 : i32
    return %c0_i32, %c0_i32_0 : i32, i32
  }
  func.func @transform_6(%arg0: i32) -> (i32, i32) {
    %c0_i32 = arith.constant 0 : i32
    %c0_i32_0 = arith.constant 0 : i32
    %c0_i32_1 = arith.constant 0 : i32
    return %c0_i32, %c0_i32_0 : i32, i32
  }
  func.func @transform_7(%arg0: i32) -> (i32, i32) {
    %c0_i32 = arith.constant 0 : i32
    %c0_i32_0 = arith.constant 0 : i32
    return %arg0, %c0_i32 : i32, i32
  }
}

</mosaic_0001>

<bundles_post_ra>
// kernel: tpu_custom_call.1
= control target key start
LH: loop header
LB: loop body
LE: loop exit
PB: predicated region body
PF: predicated region fallthrough
CT: control target
= control target key end

     0   :  { %12 = vsyncpa [#allocation4], 0  ;;  %s1018_s0 = inlined_call_operand.hbm [shape: f32[16,128], index: 0, kind: input, shape index: {}]   ;;  %s1019_s1 = inlined_call_operand.hbm [shape: f32[128,256], index: 1, kind: input, shape index: {}]   ;;  %s1020_s2 = inlined_call_operand.vmem [shape: f32[1,256], index: 2, kind: input, shape index: {}]   ;;  %s1021_s3 = inlined_call_operand.hbm [shape: f32[2,256,256], index: 3, kind: input, shape index: {}]   ;;  %s1022_s4 = inlined_call_operand.vmem [shape: f32[2,1,256], index: 4, kind: input, shape index: {}]   ;;  %s1023_s5 = inlined_call_operand.hbm [shape: f32[256,128], index: 5, kind: input, shape index: {}]   ;;  %s1024_s6 = inlined_call_operand.vmem [shape: f32[1,128], index: 6, kind: input, shape index: {}]   ;;  %s1025_s7 = inlined_call_operand.hbm [shape: f32[16,128], index: 7, kind: output, shape index: {}]  }
   0x1   :  { %13 = vsyncpa [#allocation7], 0 }
   0x2   :  { %14 = vsyncpa [#allocation10], 0 }
   0x3   :  { %15 = vsyncpa [#allocation5], 0  ;;  %s914_s24 = smov [#allocation6]  }
   0x4   :  { %s33_s25 = sshll.u32 %s914_s24, 4  ;;  %s34_s25 = int_to_ptr.vmem [resolvable:$true] %s33_s25 }
   0x5   :  { %s814_s26 = scalar_lea.vmem %s34_s25, 4096  ;;  %p819_p1 = scmp.lt.s32.totalorder %s34_s25, %s34_s25 }
   0x6   :  { %p815_p0 = scmp.ne.s32.totalorder %s34_s25, %s814_s26  ;;  %p820_p2 = scmp.lt.s32.totalorder %s814_s26, %s814_s26 }
   0x8   :  { %p821_p3 = por %p820_p2, %p819_p1 }
   0xa   :  { %p822_p4 = pnand %p821_p3, %p815_p0 }
   0xc   :  { %825 = shalt.err (!%p822_p4)
}
   0xd   :  { %s915_s27 = smov 256   ;;  %s916_s28 = smov 16  }
   0xe   :  { %39 = dma.hbm_to_vmem [thread:$0]  %s1019_s1, 4096, %s34_s25, [#allocation7], %s915_s27, %s915_s27, %s916_s28  }
   0xf   :  { %s917_s8 = smov [#allocation3]  }
  0x10   :  { %s21_s9 = sshll.u32 %s917_s8, 4  ;;  %s22_s9 = int_to_ptr.vmem [resolvable:$true] %s21_s9 }
  0x11   :  { %s834_s10 = scalar_lea.vmem %s22_s9, 256  ;;  %p839_p6 = scmp.lt.s32.totalorder %s22_s9, %s22_s9 }
  0x12   :  { %p835_p5 = scmp.ne.s32.totalorder %s22_s9, %s834_s10  ;;  %p840_p7 = scmp.lt.s32.totalorder %s834_s10, %s834_s10 }
  0x14   :  { %p841_p8 = por %p840_p7, %p839_p6 }
  0x16   :  { %p842_p9 = pnand %p841_p8, %p835_p5 }
  0x18   :  { %845 = shalt.err (!%p842_p9)
}
  0x19   :  { %s918_s11 = smov 128   ;;  %s919_s12 = smov 8  }
  0x1a   :  { %27 = dma.hbm_to_vmem [thread:$0]  %s1018_s0, 256, %s22_s9, [#allocation4], %s918_s11, %s918_s11, %s919_s12  }
  0x1b   :  { %s920_s1 = smov [#allocation8]   ;;  %s921_s16 = smov [#allocation9]  }
  0x1c   :  { %s47_s15 = sshll.u32 %s920_s1, 4  ;;  %s61_s17 = sshll.u32 %s921_s16, 4  ;;  %s48_s15 = int_to_ptr.vmem [resolvable:$true] %s47_s15  ;;  %s62_s17 = int_to_ptr.vmem [resolvable:$true] %s61_s17 }
  0x1d   :  { %s854_s18 = scalar_lea.vmem %s48_s15, 16384  ;;  %p859_p11 = scmp.lt.s32.totalorder %s48_s15, %s48_s15 }
  0x1e   :  { %p855_p10 = scmp.ne.s32.totalorder %s48_s15, %s854_s18  ;;  %p860_p12 = scmp.lt.s32.totalorder %s854_s18, %s854_s18 }
  0x20   :  { %p861_p13 = por %p860_p12, %p859_p11 }
  0x22   :  { %p862_p0 = pnand %p861_p13, %p855_p10 }
  0x24   :  { %865 = shalt.err (!%p862_p0)
}
  0x25   :  { %53 = dma.hbm_to_vmem [thread:$0]  %s1021_s3, 16384, %s48_s15, [#allocation7], %s915_s27, %s915_s27, %s916_s28  }
  0x26   :  { %s874_s0 = scalar_lea.vmem %s62_s17, 4096  ;;  %p879_p2 = scmp.lt.s32.totalorder %s62_s17, %s62_s17 }
  0x27   :  { %p875_p1 = scmp.ne.s32.totalorder %s62_s17, %s874_s0  ;;  %p880_p3 = scmp.lt.s32.totalorder %s874_s0, %s874_s0 }
  0x29   :  { %p881_p4 = por %p880_p3, %p879_p2 }
  0x2b   :  { %p882_p5 = pnand %p881_p4, %p875_p1 }
  0x2d   :  { %885 = shalt.err (!%p882_p5)
}
  0x2e   :  { %67 = dma.hbm_to_vmem [thread:$0]  %s1023_s5, 4096, %s62_s17, [#allocation10], %s918_s11, %s918_s11, %s919_s12  }
  0x2f   :  { %906 = dma.done.wait [#allocation4], 256  }
  0x30   :  { %907 = vsyncadd [#allocation4], 4294967040 }
  0x31   :  { %908 = dma.done.wait [#allocation7], 20480  }
  0x32   :  { %909 = vsyncadd [#allocation7], 4294946816 }
  0x33   :  { %910 = dma.done.wait [#allocation10], 4096  }
  0x34   :  { %911 = vsyncadd [#allocation10], 4294963200  ;;  %v922_v0 = vmov 0.0   ;;  %v115_v1 = vld [vmem:[#allocation6 + $0xf8] sm:$0xff]  ;;  %v114_v2 = vld [vmem:[#allocation6 + $0xf0] sm:$0xff]  ;;  %s923_s27 = smov [#allocation11]  }
  0x35   :  { %192 = vmatprep.mubr.f32.mxu0 %v922_v0  ;;  %v113_v3 = vld [vmem:[#allocation6 + $0xe8] sm:$0xff]  ;;  %128 = vmatprep.subr.mxu0 %v115_v1  ;;  %v112_v4 = vld [vmem:[#allocation6 + $0xe0] sm:$0xff]  ;;  %v111_v5 = vld [vmem:[#allocation6 + $0xd8] sm:$0xff]  ;;  %s718_s28 = sshll.u32 %s923_s27, 4  ;;  %s719_s28 = int_to_ptr.vmem [resolvable:$true] %s718_s28 }
  0x36   :  { %129 = vmatpush1.msra.mxu0 %v114_v2  ;;  %v110_v6 = vld [vmem:[#allocation6 + $0xd0] sm:$0xff]  ;;  %v109_v7 = vld [vmem:[#allocation6 + $0xc8] sm:$0xff]  ;;  %v108_v8 = vld [vmem:[#allocation6 + $0xc0] sm:$0xff]  ;;  %s886_s29 = scalar_lea.vmem %s719_s28, 256  ;;  %p891_p7 = scmp.lt.s32.totalorder %s719_s28, %s719_s28 }
  0x37   :  { %130 = vmatprep.subr.mxu0 %v113_v3  ;;  %v107_v9 = vld [vmem:[#allocation6 + $0xb8] sm:$0xff]  ;;  %v106_v10 = vld [vmem:[#allocation6 + $0xb0] sm:$0xff]  ;;  %v105_v11 = vld [vmem:[#allocation6 + $0xa8] sm:$0xff]  ;;  %p887_p6 = scmp.ne.s32.totalorder %s719_s28, %s886_s29  ;;  %p892_p8 = scmp.lt.s32.totalorder %s886_s29, %s886_s29 }
  0x38   :  { %131 = vmatpush1.msra.mxu0 %v112_v4  ;;  %v104_v12 = vld [vmem:[#allocation6 + $0xa0] sm:$0xff]  ;;  %v103_v13 = vld [vmem:[#allocation6 + $0x98] sm:$0xff]  ;;  %v102_v14 = vld [vmem:[#allocation6 + $0x90] sm:$0xff] }
  0x39   :  { %132 = vmatprep.subr.mxu0 %v111_v5  ;;  %v264_v15 = vld [vmem:[#allocation8 + $0xf8] sm:$0xff]  ;;  %v263_v16 = vld [vmem:[#allocation8 + $0xf0] sm:$0xff]  ;;  %v101_v17 = vld [vmem:[#allocation6 + $0x88] sm:$0xff]  ;;  %p893_p9 = por %p892_p8, %p891_p7 }
  0x3a   :  { %133 = vmatpush1.msra.mxu0 %v110_v6  ;;  %309 = vmatprep.subr.mxu1 %v264_v15  ;;  %v262_v18 = vld [vmem:[#allocation8 + $0xe8] sm:$0xff]  ;;  %v261_v19 = vld [vmem:[#allocation8 + $0xe0] sm:$0xff]  ;;  %v260_v21 = vld [vmem:[#allocation8 + $0xd8] sm:$0xff] }
  0x3b   :  { %134 = vmatprep.subr.mxu0 %v109_v7  ;;  %v100_v20 = vld [vmem:[#allocation6 + $0x80] sm:$0xff]  ;;  %310 = vmatpush1.msra.mxu1 %v263_v16  ;;  %v99_v22 = vld [vmem:[#allocation6 + $0x78] sm:$0xff]  ;;  %v259_v23 = vld [vmem:[#allocation8 + $0xd0] sm:$0xff]  ;;  %p894_p10 = pnand %p893_p9, %p887_p6 }
  0x3c   :  { %135 = vmatpush1.msra.mxu0 %v108_v8  ;;  %311 = vmatprep.subr.mxu1 %v262_v18  ;;  %v98_v24 = vld [vmem:[#allocation6 + $0x70] sm:$0xff]  ;;  %v258_v25 = vld [vmem:[#allocation8 + $0xc8] sm:$0xff]  ;;  %v257_v27 = vld [vmem:[#allocation8 + $0xc0] sm:$0xff] }
  0x3d   :  { %136 = vmatprep.subr.mxu0 %v107_v9  ;;  %312 = vmatpush1.msra.mxu1 %v261_v19  ;;  %v97_v26 = vld [vmem:[#allocation6 + $0x68] sm:$0xff]  ;;  %v96_v28 = vld [vmem:[#allocation6 + $0x60] sm:$0xff]  ;;  %v256_v29 = vld [vmem:[#allocation8 + $0xb8] sm:$0xff] }
  0x3e   :  { %137 = vmatpush1.msra.mxu0 %v106_v10  ;;  %313 = vmatprep.subr.mxu1 %v260_v21  ;;  %v95_v30 = vld [vmem:[#allocation6 + $0x58] sm:$0xff]  ;;  %v255_v31 = vld [vmem:[#allocation8 + $0xb0] sm:$0xff]  ;;  %v254_v33 = vld [vmem:[#allocation8 + $0xa8] sm:$0xff] }
  0x3f   :  { %138 = vmatprep.subr.mxu0 %v105_v11  ;;  %314 = vmatpush1.msra.mxu1 %v259_v23  ;;  %v94_v32 = vld [vmem:[#allocation6 + $0x50] sm:$0xff]  ;;  %v93_v34 = vld [vmem:[#allocation6 + $0x48] sm:$0xff]  ;;  %v253_v35 = vld [vmem:[#allocation8 + $0xa0] sm:$0xff] }
  0x40   :  { %139 = vmatpush1.msra.mxu0 %v104_v12  ;;  %315 = vmatprep.subr.mxu1 %v258_v25  ;;  %v92_v36 = vld [vmem:[#allocation6 + $0x40] sm:$0xff]  ;;  %v252_v37 = vld [vmem:[#allocation8 + $0x98] sm:$0xff]  ;;  %v251_v39 = vld [vmem:[#allocation8 + $0x90] sm:$0xff] }
  0x41   :  { %140 = vmatprep.subr.mxu0 %v103_v13  ;;  %316 = vmatpush1.msra.mxu1 %v257_v27  ;;  %v91_v38 = vld [vmem:[#allocation6 + $0x38] sm:$0xff]  ;;  %v90_v40 = vld [vmem:[#allocation6 + $0x30] sm:$0xff]  ;;  %v250_v41 = vld [vmem:[#allocation8 + $0x88] sm:$0xff] }
  0x42   :  { %141 = vmatpush1.msra.mxu0 %v102_v14  ;;  %317 = vmatprep.subr.mxu1 %v256_v29  ;;  %v89_v42 = vld [vmem:[#allocation6 + $0x28] sm:$0xff]  ;;  %v249_v43 = vld [vmem:[#allocation8 + $0x80] sm:$0xff]  ;;  %v248_v45 = vld [vmem:[#allocation8 + $0x78] sm:$0xff] }
  0x43   :  { %142 = vmatprep.subr.mxu0 %v101_v17  ;;  %318 = vmatpush1.msra.mxu1 %v255_v31  ;;  %v88_v44 = vld [vmem:[#allocation6 + $0x20] sm:$0xff]  ;;  %v87_v46 = vld [vmem:[#allocation6 + $0x18] sm:$0xff]  ;;  %v247_v47 = vld [vmem:[#allocation8 + $0x70] sm:$0xff] }
  0x44   :  { %143 = vmatpush1.msra.mxu0 %v100_v20  ;;  %319 = vmatprep.subr.mxu1 %v254_v33  ;;  %v86_v48 = vld [vmem:[#allocation6 + $0x10] sm:$0xff]  ;;  %v246_v49 = vld [vmem:[#allocation8 + $0x68] sm:$0xff]  ;;  %v245_v51 = vld [vmem:[#allocation8 + $0x60] sm:$0xff] }
  0x45   :  { %144 = vmatprep.subr.mxu0 %v99_v22  ;;  %320 = vmatpush1.msra.mxu1 %v253_v35  ;;  %v85_v50 = vld [vmem:[#allocation6 + $0x8] sm:$0xff]  ;;  %v84_v52 = vld [vmem:[#allocation6] sm:$0xff]  ;;  %v244_v53 = vld [vmem:[#allocation8 + $0x58] sm:$0xff] }
  0x46   :  { %145 = vmatpush1.msra.mxu0 %v98_v24  ;;  %321 = vmatprep.subr.mxu1 %v252_v37  ;;  %v82_v54 = vld [vmem:[#allocation3] sm:$0xff]  ;;  %v242_v56 = vld [vmem:[#allocation8 + $0x48] sm:$0xff]  ;;  %v241_v57 = vld [vmem:[#allocation8 + $0x40] sm:$0xff] }
  0x47   :  { %146 = vmatprep.subr.mxu0 %v97_v26  ;;  %322 = vmatpush1.msra.mxu1 %v251_v39  ;;  %v243_v55 = vld [vmem:[#allocation8 + $0x50] sm:$0xff]  ;;  %v240_v58 = vld [vmem:[#allocation8 + $0x38] sm:$0xff]  ;;  %v238_v61 = vld [vmem:[#allocation8 + $0x28] sm:$0xff] }
  0x48   :  { %147 = vmatpush1.msra.mxu0 %v96_v28  ;;  %323 = vmatprep.subr.mxu1 %v250_v41  ;;  %v83_v59 = vld [vmem:[#allocation3 + $0x8] sm:$0xff]  ;;  %v239_v60 = vld [vmem:[#allocation8 + $0x30] sm:$0xff]  ;;  %v237_v62 = vld [vmem:[#allocation8 + $0x20] sm:$0xff] }
  0x49   :  { %148 = vmatprep.subr.mxu0 %v95_v30  ;;  %324 = vmatpush1.msra.mxu1 %v249_v43  ;;  %v236_v63 = vld [vmem:[#allocation8 + $0x18] sm:$0xff]  ;;  %v235_v1 = vld [vmem:[#allocation8 + $0x10] sm:$0xff]  ;;  %v234_v2 = vld [vmem:[#allocation8 + $0x8] sm:$0xff] }
  0x4a   :  { %149 = vmatpush1.msra.mxu0 %v94_v32  ;;  %325 = vmatprep.subr.mxu1 %v248_v45  ;;  %v233_v3 = vld [vmem:[#allocation8] sm:$0xff]  ;;  %v296_v4 = vld [vmem:[#allocation8 + $0x1f8] sm:$0xff]  ;;  %v294_v5 = vld [vmem:[#allocation8 + $0x1e8] sm:$0xff] }
  0x4b   :  { %150 = vmatprep.subr.mxu0 %v93_v34  ;;  %326 = vmatpush1.msra.mxu1 %v247_v47  ;;  %v293_v6 = vld [vmem:[#allocation8 + $0x1e0] sm:$0xff]  ;;  %v292_v7 = vld [vmem:[#allocation8 + $0x1d8] sm:$0xff]  ;;  %v291_v8 = vld [vmem:[#allocation8 + $0x1d0] sm:$0xff] }
  0x4c   :  { %151 = vmatpush1.msra.mxu0 %v92_v36  ;;  %327 = vmatprep.subr.mxu1 %v246_v49  ;;  %v290_v9 = vld [vmem:[#allocation8 + $0x1c8] sm:$0xff]  ;;  %v289_v10 = vld [vmem:[#allocation8 + $0x1c0] sm:$0xff]  ;;  %v288_v11 = vld [vmem:[#allocation8 + $0x1b8] sm:$0xff] }
  0x4d   :  { %152 = vmatprep.subr.mxu0 %v91_v38  ;;  %328 = vmatpush1.msra.mxu1 %v245_v51  ;;  %v287_v12 = vld [vmem:[#allocation8 + $0x1b0] sm:$0xff]  ;;  %v286_v13 = vld [vmem:[#allocation8 + $0x1a8] sm:$0xff]  ;;  %v285_v14 = vld [vmem:[#allocation8 + $0x1a0] sm:$0xff] }
  0x4e   :  { %153 = vmatpush1.msra.mxu0 %v90_v40  ;;  %329 = vmatprep.subr.mxu1 %v244_v53  ;;  %v284_v15 = vld [vmem:[#allocation8 + $0x198] sm:$0xff]  ;;  %v283_v16 = vld [vmem:[#allocation8 + $0x190] sm:$0xff]  ;;  %v282_v17 = vld [vmem:[#allocation8 + $0x188] sm:$0xff] }
  0x4f   :  { %154 = vmatprep.subr.mxu0 %v89_v42  ;;  %330 = vmatpush1.msra.mxu1 %v243_v55  ;;  %v281_v18 = vld [vmem:[#allocation8 + $0x180] sm:$0xff]  ;;  %v280_v19 = vld [vmem:[#allocation8 + $0x178] sm:$0xff]  ;;  %v279_v20 = vld [vmem:[#allocation8 + $0x170] sm:$0xff] }
  0x50   :  { %155 = vmatpush1.msra.mxu0 %v88_v44  ;;  %331 = vmatprep.subr.mxu1 %v242_v56  ;;  %v278_v21 = vld [vmem:[#allocation8 + $0x168] sm:$0xff]  ;;  %v277_v22 = vld [vmem:[#allocation8 + $0x160] sm:$0xff]  ;;  %v276_v23 = vld [vmem:[#allocation8 + $0x158] sm:$0xff] }
  0x51   :  { %156 = vmatprep.subr.mxu0 %v87_v46  ;;  %332 = vmatpush1.msra.mxu1 %v241_v57  ;;  %v275_v24 = vld [vmem:[#allocation8 + $0x150] sm:$0xff]  ;;  %v274_v25 = vld [vmem:[#allocation8 + $0x148] sm:$0xff]  ;;  %v273_v26 = vld [vmem:[#allocation8 + $0x140] sm:$0xff] }
  0x52   :  { %157 = vmatpush1.msra.mxu0 %v86_v48  ;;  %333 = vmatprep.subr.mxu1 %v240_v58  ;;  %v272_v27 = vld [vmem:[#allocation8 + $0x138] sm:$0xff]  ;;  %v271_v28 = vld [vmem:[#allocation8 + $0x130] sm:$0xff]  ;;  %v270_v29 = vld [vmem:[#allocation8 + $0x128] sm:$0xff] }
  0x53   :  { %158 = vmatprep.subr.mxu0 %v85_v50  ;;  %334 = vmatpush1.msra.mxu1 %v239_v60  ;;  %v269_v30 = vld [vmem:[#allocation8 + $0x120] sm:$0xff]  ;;  %v268_v31 = vld [vmem:[#allocation8 + $0x118] sm:$0xff]  ;;  %v267_v32 = vld [vmem:[#allocation8 + $0x110] sm:$0xff] }
  0x54   :  { %159 = vmatpush1.msra.mxu0 %v84_v52  ;;  %335 = vmatprep.subr.mxu1 %v238_v61  ;;  %v266_v33 = vld [vmem:[#allocation8 + $0x108] sm:$0xff]  ;;  %v265_v34 = vld [vmem:[#allocation8 + $0x100] sm:$0xff]  ;;  %v446_v35 = vld [vmem:[#allocation8 + $0x2f8] sm:$0xff] }
  0x55   :  { %193 = vmatmul.mubr.f32.vlgmr.msra.gmra.mxu0 %v82_v54  ;;  %336 = vmatpush1.msra.mxu1 %v237_v62  ;;  %v445_v36 = vld [vmem:[#allocation8 + $0x2f0] sm:$0xff]  ;;  %v444_v37 = vld [vmem:[#allocation8 + $0x2e8] sm:$0xff]  ;;  %v443_v38 = vld [vmem:[#allocation8 + $0x2e0] sm:$0xff] }
  0x56   :  { %198 = vmatprep.mubr.f32.mxu0 %v922_v0  ;;  %337 = vmatprep.subr.mxu1 %v236_v63  ;;  %v295_v0 = vld [vmem:[#allocation8 + $0x1f0] sm:$0xff]  ;;  %v442_v39 = vld [vmem:[#allocation8 + $0x2d8] sm:$0xff]  ;;  %v440_v41 = vld [vmem:[#allocation8 + $0x2c8] sm:$0xff] }
  0x57   :  { %338 = vmatpush1.msra.mxu1 %v235_v1  ;;  %492 = vmatprep.subr.mxu0 %v446_v35  ;;  %v441_v40 = vld [vmem:[#allocation8 + $0x2d0] sm:$0xff]  ;;  %v439_v42 = vld [vmem:[#allocation8 + $0x2c0] sm:$0xff]  ;;  %v438_v43 = vld [vmem:[#allocation8 + $0x2b8] sm:$0xff] }
  0x58   :  { %339 = vmatprep.subr.mxu1 %v234_v2  ;;  %493 = vmatpush1.msra.mxu0 %v445_v36  ;;  %v437_v44 = vld [vmem:[#allocation8 + $0x2b0] sm:$0xff]  ;;  %v436_v45 = vld [vmem:[#allocation8 + $0x2a8] sm:$0xff]  ;;  %v435_v46 = vld [vmem:[#allocation8 + $0x2a0] sm:$0xff] }
  0x59   :  { %199 = vmatmul.mubr.f32.gmra.mxu0 %v83_v59  ;;  %340 = vmatpush1.msra.mxu1 %v233_v3  ;;  %v434_v47 = vld [vmem:[#allocation8 + $0x298] sm:$0xff]  ;;  %v433_v48 = vld [vmem:[#allocation8 + $0x290] sm:$0xff]  ;;  %v432_v49 = vld [vmem:[#allocation8 + $0x288] sm:$0xff] }
  0x5a   :  { %341 = vmatprep.subr.mxu1 %v296_v4  ;;  %494 = vmatprep.subr.mxu0 %v444_v37  ;;  %v431_v50 = vld [vmem:[#allocation8 + $0x280] sm:$0xff]  ;;  %v430_v51 = vld [vmem:[#allocation8 + $0x278] sm:$0xff]  ;;  %v429_v52 = vld [vmem:[#allocation8 + $0x270] sm:$0xff] }
  0x5b   :  { %342 = vmatpush2.msra.mxu1 %v295_v0  ;;  %495 = vmatpush1.msra.mxu0 %v443_v38  ;;  %v428_v53 = vld [vmem:[#allocation8 + $0x268] sm:$0xff]  ;;  %v427_v54 = vld [vmem:[#allocation8 + $0x260] sm:$0xff]  ;;  %v426_v55 = vld [vmem:[#allocation8 + $0x258] sm:$0xff] }
  0x5c   :  { %343 = vmatprep.subr.mxu1 %v294_v5  ;;  %496 = vmatprep.subr.mxu0 %v442_v39  ;;  %v425_v56 = vld [vmem:[#allocation8 + $0x250] sm:$0xff]  ;;  %v424_v57 = vld [vmem:[#allocation8 + $0x248] sm:$0xff]  ;;  %v423_v58 = vld [vmem:[#allocation8 + $0x240] sm:$0xff] }
  0x5d   :  { %344 = vmatpush2.msra.mxu1 %v293_v6  ;;  %497 = vmatpush1.msra.mxu0 %v441_v40  ;;  %v422_v59 = vld [vmem:[#allocation8 + $0x238] sm:$0xff]  ;;  %v421_v60 = vld [vmem:[#allocation8 + $0x230] sm:$0xff]  ;;  %v420_v61 = vld [vmem:[#allocation8 + $0x228] sm:$0xff] }
  0x5e   :  { %345 = vmatprep.subr.mxu1 %v292_v7  ;;  %498 = vmatprep.subr.mxu0 %v440_v41  ;;  %v419_v62 = vld [vmem:[#allocation8 + $0x220] sm:$0xff]  ;;  %v418_v63 = vld [vmem:[#allocation8 + $0x218] sm:$0xff]  ;;  %v417_v1 = vld [vmem:[#allocation8 + $0x210] sm:$0xff] }
  0x5f   :  { %346 = vmatpush2.msra.mxu1 %v291_v8  ;;  %499 = vmatpush1.msra.mxu0 %v439_v42  ;;  %v416_v2 = vld [vmem:[#allocation8 + $0x208] sm:$0xff]  ;;  %v415_v3 = vld [vmem:[#allocation8 + $0x200] sm:$0xff]  ;;  %v478_v4 = vld [vmem:[#allocation8 + $0x3f8] sm:$0xff] }
  0x60   :  { %347 = vmatprep.subr.mxu1 %v290_v9  ;;  %500 = vmatprep.subr.mxu0 %v438_v43  ;;  %v477_v0 = vld [vmem:[#allocation8 + $0x3f0] sm:$0xff]  ;;  %v476_v5 = vld [vmem:[#allocation8 + $0x3e8] sm:$0xff]  ;;  %v475_v6 = vld [vmem:[#allocation8 + $0x3e0] sm:$0xff]  ;;  %v118_v9 = vlaneseq }
  0x61   :  { %348 = vmatpush2.msra.mxu1 %v289_v10  ;;  %501 = vmatpush1.msra.mxu0 %v437_v44  ;;  %v474_v7 = vld [vmem:[#allocation8 + $0x3d8] sm:$0xff]  ;;  %v473_v8 = vld [vmem:[#allocation8 + $0x3d0] sm:$0xff]  ;;  %v472_v44 = vld [vmem:[#allocation8 + $0x3c8] sm:$0xff] }
  0x62   :  { %349 = vmatprep.subr.mxu1 %v288_v11  ;;  %502 = vmatprep.subr.mxu0 %v436_v45  ;;  %v119_v10 = vshrl.u32 %v118_v9, 7  ;;  %v471_v45 = vld [vmem:[#allocation8 + $0x3c0] sm:$0xff]  ;;  %v611_v9 = vld [vmem:[#allocation9 + $0x70] sm:$0xff] }
  0x63   :  { %350 = vmatpush2.msra.mxu1 %v287_v12  ;;  %503 = vmatpush1.msra.mxu0 %v435_v46  ;;  %v116_v12 = vld [vmem:[%s1020_s2] sm:$0x3]  ;;  %v470_v46 = vld [vmem:[#allocation8 + $0x3b8] sm:$0xff] }
  0x64   :  { %351 = vmatprep.subr.mxu1 %v286_v13  ;;  %504 = vmatprep.subr.mxu0 %v434_v47  ;;  %v990_v11 = vsub.s32 0, %v119_v10  ;;  %v995_v13 = vsub.s32 1, %v119_v10  ;;  %v469_v47 = vld [vmem:[#allocation8 + $0x3b0] sm:$0xff]  ;;  %v626_v10 = vld [vmem:[#allocation9 + $0xe8] sm:$0xff] }
  0x65   :  { %352 = vmatpush2.msra.mxu1 %v285_v14  ;;  %505 = vmatpush1.msra.mxu0 %v433_v48  ;;  %v468_v48 = vld [vmem:[#allocation8 + $0x3a8] sm:$0xff] }
  0x66   :  { %353 = vmatprep.subr.mxu1 %v284_v15  ;;  %506 = vmatprep.subr.mxu0 %v432_v49  ;;  %v121_v14 = vrot.slane %v116_v12, %v990_v11  ;;  %v125_v15 = vrot.slane %v116_v12, %v995_v13  ;;  %v467_v49 = vld [vmem:[#allocation8 + $0x3a0] sm:$0xff]  ;;  %v610_v12 = vld [vmem:[#allocation9 + $0x68] sm:$0xff] }
  0x67   :  { %354 = vmatpush2.msra.mxu1 %v283_v16  ;;  %507 = vmatpush1.msra.mxu0 %v431_v50  ;;  %v466_v50 = vld [vmem:[#allocation8 + $0x398] sm:$0xff] }
  0x68   :  { %355 = vmatprep.subr.mxu1 %v282_v17  ;;  %508 = vmatprep.subr.mxu0 %v430_v51  ;;  %v465_v51 = vld [vmem:[#allocation8 + $0x390] sm:$0xff] }
  0x69   :  { %356 = vmatpush2.msra.mxu1 %v281_v18  ;;  %509 = vmatpush1.msra.mxu0 %v429_v52  ;;  %v464_v52 = vld [vmem:[#allocation8 + $0x388] sm:$0xff] }
  0x6a   :  { %357 = vmatprep.subr.mxu1 %v280_v19  ;;  %510 = vmatprep.subr.mxu0 %v428_v53  ;;  %v463_v53 = vld [vmem:[#allocation8 + $0x380] sm:$0xff] }
  0x6b   :  { %358 = vmatpush2.msra.mxu1 %v279_v20  ;;  %511 = vmatpush1.msra.mxu0 %v427_v54  ;;  %v462_v54 = vld [vmem:[#allocation8 + $0x378] sm:$0xff] }
  0x6c   :  { %359 = vmatprep.subr.mxu1 %v278_v21  ;;  %512 = vmatprep.subr.mxu0 %v426_v55  ;;  %v461_v55 = vld [vmem:[#allocation8 + $0x370] sm:$0xff] }
  0x6d   :  { %360 = vmatpush2.msra.mxu1 %v277_v22  ;;  %513 = vmatpush1.msra.mxu0 %v425_v56  ;;  %v460_v56 = vld [vmem:[#allocation8 + $0x368] sm:$0xff] }
  0x6e   :  { %361 = vmatprep.subr.mxu1 %v276_v23  ;;  %514 = vmatprep.subr.mxu0 %v424_v57  ;;  %v459_v57 = vld [vmem:[#allocation8 + $0x360] sm:$0xff] }
  0x6f   :  { %362 = vmatpush2.msra.mxu1 %v275_v24  ;;  %515 = vmatpush1.msra.mxu0 %v423_v58  ;;  %v458_v58 = vld [vmem:[#allocation8 + $0x358] sm:$0xff] }
  0x70   :  { %363 = vmatprep.subr.mxu1 %v274_v25  ;;  %516 = vmatprep.subr.mxu0 %v422_v59  ;;  %v457_v59 = vld [vmem:[#allocation8 + $0x350] sm:$0xff] }
  0x71   :  { %364 = vmatpush2.msra.mxu1 %v273_v26  ;;  %517 = vmatpush1.msra.mxu0 %v421_v60  ;;  %v456_v60 = vld [vmem:[#allocation8 + $0x348] sm:$0xff] }
  0x72   :  { %365 = vmatprep.subr.mxu1 %v272_v27  ;;  %518 = vmatprep.subr.mxu0 %v420_v61  ;;  %v455_v61 = vld [vmem:[#allocation8 + $0x340] sm:$0xff] }
  0x73   :  { %366 = vmatpush2.msra.mxu1 %v271_v28  ;;  %519 = vmatpush1.msra.mxu0 %v419_v62  ;;  %v454_v62 = vld [vmem:[#allocation8 + $0x338] sm:$0xff] }
  0x74   :  { %367 = vmatprep.subr.mxu1 %v270_v29  ;;  %520 = vmatprep.subr.mxu0 %v418_v63  ;;  %v453_v63 = vld [vmem:[#allocation8 + $0x330] sm:$0xff] }
  0x75   :  { %368 = vmatpush2.msra.mxu1 %v269_v30  ;;  %521 = vmatpush1.msra.mxu0 %v417_v1  ;;  %v452_v1 = vld [vmem:[#allocation8 + $0x328] sm:$0xff] }
  0x76   :  { %369 = vmatprep.subr.mxu1 %v268_v31  ;;  %522 = vmatprep.subr.mxu0 %v416_v2  ;;  %v451_v2 = vld [vmem:[#allocation8 + $0x320] sm:$0xff] }
  0x77   :  { %370 = vmatpush2.msra.mxu1 %v267_v32  ;;  %523 = vmatpush1.msra.mxu0 %v415_v3  ;;  %v450_v3 = vld [vmem:[#allocation8 + $0x318] sm:$0xff] }
  0x78   :  { %371 = vmatprep.subr.mxu1 %v266_v33  ;;  %524 = vmatprep.subr.mxu0 %v478_v4  ;;  %v449_v4 = vld [vmem:[#allocation8 + $0x310] sm:$0xff] }
  0x79   :  { %372 = vmatpush2.msra.mxu1 %v265_v34  ;;  %525 = vmatpush2.msra.mxu0 %v477_v0  ;;  %v448_v0 = vld [vmem:[#allocation8 + $0x308] sm:$0xff] }
  0x7a   :  { %526 = vmatprep.subr.mxu0 %v476_v5  ;;  %v447_v5 = vld [vmem:[#allocation8 + $0x300] sm:$0xff] }
  0x7b   :  { %527 = vmatpush2.msra.mxu0 %v475_v6  ;;  %v628_v6 = vld [vmem:[#allocation9 + $0xf8] sm:$0xff] }
  0x7c   :  { %528 = vmatprep.subr.mxu0 %v474_v7  ;;  %v612_v7 = vld [vmem:[#allocation9 + $0x78] sm:$0xff]  ;;  %734 = vmatprep.subr.mxu1 %v628_v6  ;;  %v597_v6 = vld [vmem:[#allocation9] sm:$0xff] }
  0x7d   :  { %529 = vmatpush2.msra.mxu0 %v473_v8  ;;  %v627_v8 = vld [vmem:[#allocation9 + $0xf0] sm:$0xff] }
  0x7e   :  { %530 = vmatprep.subr.mxu0 %v472_v44 }
  0x7f   :  { %531 = vmatpush2.msra.mxu0 %v471_v45  ;;  %v625_v45 = vld [vmem:[#allocation9 + $0xe0] sm:$0xff] }
  0x80   :  { %532 = vmatprep.subr.mxu0 %v470_v46  ;;  %v609_v46 = vld [vmem:[#allocation9 + $0x60] sm:$0xff] }
  0x81   :  { %533 = vmatpush2.msra.mxu0 %v469_v47  ;;  %v624_v47 = vld [vmem:[#allocation9 + $0xd8] sm:$0xff] }
  0x82   :  { %534 = vmatprep.subr.mxu0 %v468_v48  ;;  %v608_v48 = vld [vmem:[#allocation9 + $0x58] sm:$0xff] }
  0x83   :  { %535 = vmatpush2.msra.mxu0 %v467_v49  ;;  %v623_v49 = vld [vmem:[#allocation9 + $0xd0] sm:$0xff] }
  0x84   :  { %536 = vmatprep.subr.mxu0 %v466_v50  ;;  %v607_v50 = vld [vmem:[#allocation9 + $0x50] sm:$0xff] }
  0x85   :  { %537 = vmatpush2.msra.mxu0 %v465_v51  ;;  %v622_v51 = vld [vmem:[#allocation9 + $0xc8] sm:$0xff] }
  0x86   :  { %538 = vmatprep.subr.mxu0 %v464_v52  ;;  %v606_v52 = vld [vmem:[#allocation9 + $0x48] sm:$0xff] }
  0x87   :  { %539 = vmatpush2.msra.mxu0 %v463_v53  ;;  %v621_v53 = vld [vmem:[#allocation9 + $0xc0] sm:$0xff] }
  0x88   :  { %540 = vmatprep.subr.mxu0 %v462_v54  ;;  %v605_v54 = vld [vmem:[#allocation9 + $0x40] sm:$0xff] }
  0x89   :  { %541 = vmatpush2.msra.mxu0 %v461_v55  ;;  %v620_v55 = vld [vmem:[#allocation9 + $0xb8] sm:$0xff] }
  0x8a   :  { %542 = vmatprep.subr.mxu0 %v460_v56  ;;  %v604_v56 = vld [vmem:[#allocation9 + $0x38] sm:$0xff] }
  0x8b   :  { %543 = vmatpush2.msra.mxu0 %v459_v57  ;;  %v619_v57 = vld [vmem:[#allocation9 + $0xb0] sm:$0xff] }
  0x8c   :  { %544 = vmatprep.subr.mxu0 %v458_v58  ;;  %v603_v58 = vld [vmem:[#allocation9 + $0x30] sm:$0xff] }
  0x8d   :  { %545 = vmatpush2.msra.mxu0 %v457_v59  ;;  %v618_v59 = vld [vmem:[#allocation9 + $0xa8] sm:$0xff] }
  0x8e   :  { %546 = vmatprep.subr.mxu0 %v456_v60  ;;  %v602_v60 = vld [vmem:[#allocation9 + $0x28] sm:$0xff] }
  0x8f   :  { %547 = vmatpush2.msra.mxu0 %v455_v61  ;;  %v617_v61 = vld [vmem:[#allocation9 + $0xa0] sm:$0xff] }
  0x90   :  { %548 = vmatprep.subr.mxu0 %v454_v62  ;;  %v601_v62 = vld [vmem:[#allocation9 + $0x20] sm:$0xff] }
  0x91   :  { %549 = vmatpush2.msra.mxu0 %v453_v63  ;;  %v616_v63 = vld [vmem:[#allocation9 + $0x98] sm:$0xff] }
  0x92   :  { %550 = vmatprep.subr.mxu0 %v452_v1  ;;  %v600_v1 = vld [vmem:[#allocation9 + $0x18] sm:$0xff] }
  0x93   :  { %551 = vmatpush2.msra.mxu0 %v451_v2  ;;  %v615_v2 = vld [vmem:[#allocation9 + $0x90] sm:$0xff] }
  0x94   :  { %552 = vmatprep.subr.mxu0 %v450_v3  ;;  %v599_v3 = vld [vmem:[#allocation9 + $0x10] sm:$0xff] }
  0x95   :  { %553 = vmatpush2.msra.mxu0 %v449_v4  ;;  %v614_v4 = vld [vmem:[#allocation9 + $0x88] sm:$0xff] }
  0x96   :  { %554 = vmatprep.subr.mxu0 %v448_v0  ;;  %v598_v0 = vld [vmem:[#allocation9 + $0x8] sm:$0xff] }
  0x97   :  { %555 = vmatpush2.msra.mxu0 %v447_v5  ;;  %v613_v5 = vld [vmem:[#allocation9 + $0x80] sm:$0xff] }
 0x115   :  { %v194_v16 = vpop.f32.mrf.mxu0 }
 0x116   :  { %v195_v17 = vadd.f32 %v194_v16, %v121_v14 }
 0x117   :  { %v196_v18 = vpop.f32.mrf.mxu0 }
 0x118   :  { %v209_v19 = vmul.f32 0.70710677, %v195_v17  ;;  %v197_v20 = vadd.f32 %v196_v18, %v125_v15  ;;  %v205_v34 = vmul.f32 0.5, %v195_v17 }
 0x119   :  { %v200_v21 = vpop.f32.mrf.mxu0 }
 0x11a   :  { %782 = verf.f32 %v209_v19  ;;  %v210_v22 = vmul.f32 0.70710677, %v197_v20  ;;  %v201_v23 = vadd.f32 %v200_v21, %v121_v14  ;;  %v206_v31 = vmul.f32 0.5, %v197_v20  ;;  %v297_v14 = vld [vmem:[%s1022_s4] sm:$0x3] }
 0x11b   :  { %v202_v24 = vpop.f32.mrf.mxu0  ;;  %v306_v16 = vrot.slane %v297_v14, %v995_v13 }
 0x11c   :  { %784 = verf.f32 %v210_v22  ;;  %v211_v25 = vmul.f32 0.70710677, %v201_v23  ;;  %v203_v26 = vadd.f32 %v202_v24, %v125_v15  ;;  %v207_v41 = vmul.f32 0.5, %v201_v23 }
 0x11d   :  { %v302_v15 = vrot.slane %v297_v14, %v990_v11 }
 0x11e   :  { %786 = verf.f32 %v211_v25  ;;  %v212_v27 = vmul.f32 0.70710677, %v203_v26  ;;  %v208_v39 = vmul.f32 0.5, %v203_v26 }
 0x120   :  { %788 = verf.f32 %v212_v27 }
 0x127   :  { %v783_v28 = vpop.eup %782 }
 0x128   :  { %v217_v30 = vadd.f32 1.0, %v783_v28 }
 0x129   :  { %v785_v29 = vpop.eup %784 }
 0x12a   :  { %v218_v32 = vadd.f32 1.0, %v785_v29  ;;  %v221_v37 = vmul.f32 %v217_v30, %v205_v34 }
 0x12b   :  { %v787_v33 = vpop.eup %786 }
 0x12c   :  { %v222_v35 = vmul.f32 %v218_v32, %v206_v31  ;;  %v219_v38 = vadd.f32 1.0, %v787_v33 }
 0x12d   :  { %v789_v36 = vpop.eup %788 }
 0x12e   :  { %373 = vmatprep.mubr.f32.mxu1 %v222_v35  ;;  %v220_v40 = vadd.f32 1.0, %v789_v36  ;;  %v223_v43 = vmul.f32 %v219_v38, %v207_v41 }
 0x12f   :  { %374 = vmatmul.mubr.f32.vlgmr.msra.gmra.mxu1 %v221_v37 }
 0x130   :  { %v224_v42 = vmul.f32 %v220_v40, %v208_v39  ;;  %735 = vmatpush3.msra.mxu1 %v612_v7  ;;  %v732_v7 = vld [vmem:[%s1022_s4 + $0x2] sm:$0x3] }
 0x131   :  { %736 = vmatprep.subr.mxu1 %v627_v8  ;;  %v485_v8 = vrot.slane %v732_v7, %v990_v11 }
 0x132   :  { %379 = vmatprep.mubr.f32.mxu1 %v224_v42  ;;  %737 = vmatpush3.msra.mxu1 %v611_v9  ;;  %v489_v9 = vrot.slane %v732_v7, %v995_v13 }
 0x133   :  { %380 = vmatmul.mubr.f32.gmra.mxu1 %v223_v43  ;;  %738 = vmatprep.subr.mxu1 %v626_v10 }
 0x134   :  { %739 = vmatpush3.msra.mxu1 %v610_v12 }
 0x135   :  { %740 = vmatprep.subr.mxu1 %v625_v45 }
 0x136   :  { %741 = vmatpush3.msra.mxu1 %v609_v46 }
 0x137   :  { %742 = vmatprep.subr.mxu1 %v624_v47 }
 0x138   :  { %743 = vmatpush3.msra.mxu1 %v608_v48 }
 0x139   :  { %744 = vmatprep.subr.mxu1 %v623_v49 }
 0x13a   :  { %745 = vmatpush3.msra.mxu1 %v607_v50 }
 0x13b   :  { %746 = vmatprep.subr.mxu1 %v622_v51 }
 0x13c   :  { %747 = vmatpush3.msra.mxu1 %v606_v52 }
 0x13d   :  { %748 = vmatprep.subr.mxu1 %v621_v53 }
 0x13e   :  { %749 = vmatpush3.msra.mxu1 %v605_v54 }
 0x13f   :  { %750 = vmatprep.subr.mxu1 %v620_v55 }
 0x140   :  { %751 = vmatpush3.msra.mxu1 %v604_v56 }
 0x141   :  { %752 = vmatprep.subr.mxu1 %v619_v57 }
 0x142   :  { %753 = vmatpush3.msra.mxu1 %v603_v58 }
 0x143   :  { %754 = vmatprep.subr.mxu1 %v618_v59 }
 0x144   :  { %755 = vmatpush3.msra.mxu1 %v602_v60 }
 0x145   :  { %756 = vmatprep.subr.mxu1 %v617_v61 }
 0x146   :  { %757 = vmatpush3.msra.mxu1 %v601_v62 }
 0x147   :  { %758 = vmatprep.subr.mxu1 %v616_v63 }
 0x148   :  { %759 = vmatpush3.msra.mxu1 %v600_v1 }
 0x149   :  { %760 = vmatprep.subr.mxu1 %v615_v2 }
 0x14a   :  { %761 = vmatpush3.msra.mxu1 %v599_v3 }
 0x14b   :  { %762 = vmatprep.subr.mxu1 %v614_v4 }
 0x14c   :  { %763 = vmatpush3.msra.mxu1 %v598_v0 }
 0x14d   :  { %764 = vmatprep.subr.mxu1 %v613_v5 }
 0x14e   :  { %765 = vmatpush3.msra.mxu1 %v597_v6 }
 0x1ef   :  { %v375_v17 = vpop.f32.mrf.mxu1 }
 0x1f0   :  { %v376_v18 = vadd.f32 %v375_v17, %v302_v15 }
 0x1f1   :  { %v377_v19 = vpop.f32.mrf.mxu1 }
 0x1f2   :  { %v390_v20 = vmul.f32 0.70710677, %v376_v18  ;;  %v378_v21 = vadd.f32 %v377_v19, %v306_v16  ;;  %v386_v35 = vmul.f32 0.5, %v376_v18 }
 0x1f3   :  { %v381_v22 = vpop.f32.mrf.mxu1 }
 0x1f4   :  { %790 = verf.f32 %v390_v20  ;;  %v391_v23 = vmul.f32 0.70710677, %v378_v21  ;;  %v382_v24 = vadd.f32 %v381_v22, %v302_v15  ;;  %v387_v32 = vmul.f32 0.5, %v378_v21 }
 0x1f5   :  { %v383_v25 = vpop.f32.mrf.mxu1 }
 0x1f6   :  { %792 = verf.f32 %v391_v23  ;;  %v392_v26 = vmul.f32 0.70710677, %v382_v24  ;;  %v384_v27 = vadd.f32 %v383_v25, %v306_v16  ;;  %v388_v42 = vmul.f32 0.5, %v382_v24 }
 0x1f8   :  { %794 = verf.f32 %v392_v26  ;;  %v393_v28 = vmul.f32 0.70710677, %v384_v27  ;;  %v389_v40 = vmul.f32 0.5, %v384_v27 }
 0x1fa   :  { %796 = verf.f32 %v393_v28 }
 0x201   :  { %v791_v29 = vpop.eup %790 }
 0x202   :  { %v398_v31 = vadd.f32 1.0, %v791_v29 }
 0x203   :  { %v793_v30 = vpop.eup %792 }
 0x204   :  { %v399_v33 = vadd.f32 1.0, %v793_v30  ;;  %v402_v38 = vmul.f32 %v398_v31, %v386_v35 }
 0x205   :  { %v795_v34 = vpop.eup %794 }
 0x206   :  { %v403_v36 = vmul.f32 %v399_v33, %v387_v32  ;;  %v400_v39 = vadd.f32 1.0, %v795_v34 }
 0x207   :  { %v797_v37 = vpop.eup %796 }
 0x208   :  { %556 = vmatprep.mubr.f32.mxu0 %v403_v36  ;;  %v401_v41 = vadd.f32 1.0, %v797_v37  ;;  %v404_v44 = vmul.f32 %v400_v39, %v388_v42  ;;  %v733_v39 = vld [vmem:[%s1024_s6] ss:$0 sm:$0xff] }
 0x209   :  { %557 = vmatmul.mubr.f32.vlgmr.msra.gmra.mxu0 %v402_v38 }
 0x20a   :  { %v405_v43 = vmul.f32 %v401_v41, %v389_v40 }
 0x20c   :  { %562 = vmatprep.mubr.f32.mxu0 %v405_v43 }
 0x20d   :  { %563 = vmatmul.mubr.f32.gmra.mxu0 %v404_v44 }
 0x2c9   :  { %v558_v10 = vpop.f32.mrf.mxu0 }
 0x2ca   :  { %v559_v12 = vadd.f32 %v558_v10, %v485_v8 }
 0x2cb   :  { %v560_v14 = vpop.f32.mrf.mxu0 }
 0x2cc   :  { %v573_v15 = vmul.f32 0.70710677, %v559_v12  ;;  %v561_v16 = vadd.f32 %v560_v14, %v489_v9  ;;  %v569_v28 = vmul.f32 0.5, %v559_v12 }
 0x2cd   :  { %v564_v17 = vpop.f32.mrf.mxu0 }
 0x2ce   :  { %798 = verf.f32 %v573_v15  ;;  %v574_v18 = vmul.f32 0.70710677, %v561_v16  ;;  %v565_v19 = vadd.f32 %v564_v17, %v485_v8  ;;  %v570_v13 = vmul.f32 0.5, %v561_v16 }
 0x2cf   :  { %v566_v20 = vpop.f32.mrf.mxu0 }
 0x2d0   :  { %800 = verf.f32 %v574_v18  ;;  %v575_v21 = vmul.f32 0.70710677, %v565_v19  ;;  %v567_v22 = vadd.f32 %v566_v20, %v489_v9  ;;  %v571_v35 = vmul.f32 0.5, %v565_v19 }
 0x2d2   :  { %802 = verf.f32 %v575_v21  ;;  %v576_v23 = vmul.f32 0.70710677, %v567_v22  ;;  %v572_v33 = vmul.f32 0.5, %v567_v22 }
 0x2d4   :  { %804 = verf.f32 %v576_v23 }
 0x2db   :  { %v799_v24 = vpop.eup %798 }
 0x2dc   :  { %v581_v25 = vadd.f32 1.0, %v799_v24 }
 0x2dd   :  { %v801_v11 = vpop.eup %800 }
 0x2de   :  { %v582_v26 = vadd.f32 1.0, %v801_v11  ;;  %v585_v31 = vmul.f32 %v581_v25, %v569_v28 }
 0x2df   :  { %v803_v27 = vpop.eup %802 }
 0x2e0   :  { %v586_v29 = vmul.f32 %v582_v26, %v570_v13  ;;  %v583_v32 = vadd.f32 1.0, %v803_v27 }
 0x2e1   :  { %v805_v30 = vpop.eup %804 }
 0x2e2   :  { %700 = vmatprep.mubr.f32.mxu1 %v586_v29  ;;  %v584_v34 = vadd.f32 1.0, %v805_v30  ;;  %v587_v37 = vmul.f32 %v583_v32, %v571_v35 }
 0x2e3   :  { %701 = vmatmul.mubr.f32.vlgmr.msra.gmra.mxu1 %v585_v31 }
 0x2e4   :  { %v588_v36 = vmul.f32 %v584_v34, %v572_v33 }
 0x2e6   :  { %705 = vmatprep.mubr.f32.mxu1 %v588_v36 }
 0x2e7   :  { %706 = vmatmul.mubr.f32.gmra.mxu1 %v587_v37 }
 0x3a3   :  { %v766_v38 = vpop.f32.mrf.mxu1 }
 0x3a5   :  { %v767_v40 = vpop.f32.mrf.mxu1 }
 0x3a6   :  { %v768_v41 = vadd.f32 %v767_v40, %v766_v38 }
 0x3a7   :  { %v769_v42 = vpop.f32.mrf.mxu1 }
 0x3a8   :  { %v703_v43 = vadd.f32 %v768_v41, %v733_v39 }
 0x3a9   :  { %v770_v44 = vpop.f32.mrf.mxu1 }
 0x3aa   :  { %711 = vst [vmem:[#allocation11] sm:$0xff] %v703_v43  ;;  %v771_v45 = vadd.f32 %v770_v44, %v769_v42 }
 0x3ac   :  { %v708_v46 = vadd.f32 %v771_v45, %v733_v39 }
 0x3ae   :  { %712 = vst [vmem:[#allocation11 + $0x8] sm:$0xff] %v708_v46 }
 0x3af   :  { %897 = shalt.err (!%p894_p10)
}
 0x3b0   :  { %724 = dma.vmem_to_hbm [thread:$0]  %s719_s28, 256, %s1025_s7, [#allocation5], %s918_s11, %s918_s11, %s919_s12  }
 0x3b1   :  { %912 = dma.done.wait [#allocation5], 256  }
 0x3b2   :  { %913 = vsyncadd [#allocation5], 4294967040 }
 0x3b3   :  { %728 = vsyncpa [#allocation4], 1 }
 0x3b4   :  { %729 = vsyncpa [#allocation7], 1 }
 0x3b5   :  { %730 = vsyncpa [#allocation10], 1 }
 0x3b6   :  { %731 = vsyncpa [#allocation5], 1 }

</bundles_post_ra>
